<compile_context>
chip_gen: v6e
topology: v6e:2x2x1
jax: 0.10.0
libtpu: 0.0.40
codegen_flags: <defaults>
</compile_context>

<pallas_src>
import math
from functools import partial

import jax
import jax.numpy as jnp
from jax import lax
from jax.experimental import pallas as pl
from jax.experimental.pallas import tpu as pltpu

_TM_CAP = 512        # max rows per tile, plain-matmul path
_TM_FLAT_CAP = 256   # max rows per tile, flat-conv path (small f32 accumulator)
_VMEM_LIMIT = None


def _round_up(x, m):
    return ((x + m - 1) // m) * m


def _choose_tm(m, cap=_TM_CAP, min_tiles=1):
    """Row tile: multiple of 16, <= cap, split into >= min_tiles tiles."""
    n = max(1, min(max(min_tiles, -(-m // cap)), -(-m // 16)))
    return _round_up(-(-m // n), 16)


def _vmem_limit_bytes():
    """Per-generation VMEM limit; never exceeds one TC's 64 MiB (v7x-safe)."""
    global _VMEM_LIMIT
    if _VMEM_LIMIT is None:
        limit = 48 * 1024 * 1024                      # safe on v5e/v6e/v7x
        per_core_cap = int(64 * 1024 * 1024 * 0.85)   # never trust per-chip #s
        try:
            cap = int(getattr(pltpu.get_tpu_info(), "vmem_capacity_bytes", 0))
            if cap >= 32 * 1024 * 1024:
                limit = min(int(cap * 0.85), per_core_cap)
        except Exception:
            pass
        _VMEM_LIMIT = limit
    return _VMEM_LIMIT


# ----------------------------------------------------------------------------
# Pallas kernels
# ----------------------------------------------------------------------------
def _mm_bias_relu_kernel(a_ref, w_ref, b_ref, o_ref):
    # a: (TM, K) bf16, w: (K, N) bf16, b: (1, N) f32, o: (TM, N) bf16
    acc = jnp.dot(a_ref[...], w_ref[...], preferred_element_type=jnp.float32)
    o_ref[...] = jnp.maximum(acc + b_ref[...], 0.0).astype(o_ref.dtype)


def _flat_conv_kernel(x_ref, w_ref, b_ref, o_ref, *, tm, offsets):
    # Implicit im2col, stride-1, kw taps pre-merged along channels:
    #   x_ref: (Lcat, Kc=kw*C) bf16 flat image,  w_ref: (kh, Kc, N) bf16,
    #   b_ref: (1, N) f32,  o_ref: (tm, N) bf16.
    # Tap di of the conv reads rows [base + di*Wp, base + di*Wp + tm); every
    # offset is a multiple of 16 (Wp and tm are padded), so reads are aligned.
    j = pl.program_id(1)
    base = pl.multiple_of(j * tm, 16)
    acc = None
    for t, off in enumerate(offsets):                 # static unroll over kh
        start = pl.multiple_of(base + off, 16)
        a = x_ref[pl.ds(start, tm), :]                # (tm, Kc) bf16
        d = jnp.dot(a, w_ref[t], preferred_element_type=jnp.float32)
        acc = d if acc is None else acc + d
    o_ref[...] = jnp.maximum(acc + b_ref[...], 0.0).astype(o_ref.dtype)


def _gap_kernel(x_ref, o_ref):
    # x: (1, H, W, C) bf16 -> o: (1, C) f32   (AdaptiveAvgPool2d((1,1)))
    o_ref[...] = jnp.mean(x_ref[...].astype(jnp.float32), axis=(1, 2))


@jax.jit
def global_avg_pool(x):
    B, H, W, C = x.shape
    return pl.pallas_call(
        _gap_kernel,
        out_shape=jax.ShapeDtypeStruct((B, C), jnp.float32),
        grid_spec=pltpu.PrefetchScalarGridSpec(
            num_scalar_prefetch=0,
            grid=(B,),
            in_specs=[pl.BlockSpec((1, H, W, C), lambda b: (b, 0, 0, 0))],
            out_specs=pl.BlockSpec((1, C), lambda b: (b, 0)),
        ),
        compiler_params=pltpu.CompilerParams(
            dimension_semantics=("parallel",),
            vmem_limit_bytes=_vmem_limit_bytes()),
    )(x)


# ----------------------------------------------------------------------------
# Conv impls
# ----------------------------------------------------------------------------
@partial(jax.jit, static_argnames=("kh", "kw", "ph", "pw", "transpose_hw"))
def _conv_flat_impl(x, w, bias, kh, kw, ph, pw, transpose_hw=False):
    """Stride-1 conv (+folded BN bias, ReLU) via in-kernel implicit im2col.

    The kw in-row taps are merged along the channel axis in the wrapper, so
    the kernel runs only kh matmuls with K = kw*C at sublane-aligned offsets.
    """
    x = x.astype(jnp.bfloat16)
    if transpose_hw:                       # (k,1) kernels become (1,k)
        x = jnp.transpose(x, (0, 2, 1, 3))
        kh, kw, ph, pw = kw, kh, pw, ph
    B, H, W, C = x.shape
    N = w.shape[1]

    Hp = H + 2 * ph
    Wp = _round_up(W + 2 * pw, 16)         # aligned flat row pitch
    OH = Hp - kh + 1
    OW = W + 2 * pw - kw + 1

    # "Wide" output rows per image: OH * Wp (columns [OW, Wp) are garbage over
    # zero padding and are sliced off afterwards).
    M = OH * Wp
    tm = _choose_tm(M, cap=_TM_FLAT_CAP)
    n_tiles = -(-M // tm)
    Mpad = n_tiles * tm
    Lcat = Mpad + (kh - 1) * Wp            # xcat rows the kernel may read
    Lflat = Lcat + (kw - 1)                # flat-image rows needed for xcat

    # One pad covering spatial padding + lane-pitch padding + tail rows.
    extra_rows = -(-max(Lflat - Hp * Wp, 0) // Wp)
    xp = jnp.pad(x, ((0, 0), (ph, ph + extra_rows),
                     (pw, Wp - W - pw), (0, 0)))
    xf = xp.reshape(B, (Hp + extra_rows) * Wp, C)
    if kw > 1:
        # kw-fold channel merge: xcat[:, p, j*C:(j+1)*C] == xf[:, p + j, :]
        xcat = jnp.concatenate([xf[:, j:j + Lcat, :] for j in range(kw)],
                               axis=-1)
    else:
        xcat = xf[:, :Lcat, :]
    Kc = kw * C

    w3 = w.reshape(kh, Kc, N)              # (kh, kw, C, N) -> (kh, kw*C, N)
    offsets = tuple(di * Wp for di in range(kh))   # all multiples of 16

    flops = 2 * B * Mpad * kh * Kc * N
    bytes_accessed = (B * Lcat * Kc + kh * Kc * N + B * Mpad * N) * 2 + N * 4

    out = pl.pallas_call(
        partial(_flat_conv_kernel, tm=tm, offsets=offsets),
        out_shape=jax.ShapeDtypeStruct((B, Mpad, N), jnp.bfloat16),
        grid_spec=pltpu.PrefetchScalarGridSpec(
            num_scalar_prefetch=0,
            grid=(B, n_tiles),
            in_specs=[
                # TODO(synk): weights/bias/per-batch image are constant over
                #             the inner axis; single-buffering them
                #             (pipeline_mode=pl.Buffered(1)) would free VMEM.
                pl.BlockSpec((None, Lcat, Kc), lambda b, j: (b, 0, 0)),
                pl.BlockSpec((kh, Kc, N), lambda b, j: (0, 0, 0)),
                pl.BlockSpec((1, N), lambda b, j: (0, 0)),
            ],
            out_specs=pl.BlockSpec((None, tm, N), lambda b, j: (b, j, 0)),
        ),
        compiler_params=pltpu.CompilerParams(
            dimension_semantics=("parallel", "parallel"),
            vmem_limit_bytes=_vmem_limit_bytes(),
        ),
        cost_estimate=pl.CostEstimate(flops=flops, transcendentals=0,
                                      bytes_accessed=bytes_accessed),
    )(xcat, w3, bias[None, :])
    out = out[:, :M].reshape(B, OH, Wp, N)[:, :, :OW, :]
    if transpose_hw:
        out = jnp.transpose(out, (0, 2, 1, 3))
    return out


@partial(jax.jit, static_argnames=("kh", "kw", "sh", "sw", "ph", "pw"))
def _conv_mm_impl(x, w, bias, kh, kw, sh, sw, ph, pw):
    """1x1 convs, stride>1 convs and small-C square convs via explicit im2col
    followed by one tiled bias+ReLU matmul (patch blowup is small for these)."""
    x = x.astype(jnp.bfloat16)
    B, H, W, C = x.shape
    N = w.shape[1]
    if ph or pw:
        x = jnp.pad(x, ((0, 0), (ph, ph), (pw, pw), (0, 0)))
    Hp, Wp = H + 2 * ph, W + 2 * pw
    OH = (Hp - kh) // sh + 1
    OW = (Wp - kw) // sw + 1

    if kh == 1 and kw == 1 and sh == 1 and sw == 1:
        patches = x.reshape(B * OH * OW, C)
    else:
        cols = []
        for di in range(kh):
            for dj in range(kw):
                cols.append(x[:, di:di + (OH - 1) * sh + 1:sh,
                              dj:dj + (OW - 1) * sw + 1:sw, :])
        patches = jnp.stack(cols, axis=3).reshape(B * OH * OW, kh * kw * C)

    M, K = patches.shape
    # >= 2 row tiles so both TensorCores of a v7x chip get work.
    tm = _choose_tm(M, cap=_TM_CAP, min_tiles=2)
    n_tiles = -(-M // tm)
    Mpad = n_tiles * tm
    if Mpad != M:
        patches = jnp.pad(patches, ((0, Mpad - M), (0, 0)))

    flops = 2 * Mpad * K * N
    bytes_accessed = (Mpad * K + K * N + Mpad * N) * 2 + N * 4

    out = pl.pallas_call(
        _mm_bias_relu_kernel,
        out_shape=jax.ShapeDtypeStruct((Mpad, N), jnp.bfloat16),
        grid_spec=pltpu.PrefetchScalarGridSpec(
            num_scalar_prefetch=0,
            grid=(n_tiles,),
            in_specs=[
                pl.BlockSpec((tm, K), lambda i: (i, 0)),
                pl.BlockSpec((K, N), lambda i: (0, 0)),
                pl.BlockSpec((1, N), lambda i: (0, 0)),
            ],
            out_specs=pl.BlockSpec((tm, N), lambda i: (i, 0)),
        ),
        compiler_params=pltpu.CompilerParams(
            dimension_semantics=("parallel",),
            vmem_limit_bytes=_vmem_limit_bytes(),
        ),
        cost_estimate=pl.CostEstimate(flops=flops, transcendentals=0,
                                      bytes_accessed=bytes_accessed),
    )(patches, w, bias[None, :])
    return out[:M].reshape(B, OH, OW, N)


def apply_conv(x, p):
    kh, kw, sh, sw, ph, pw = (p["kh"], p["kw"], p["sh"],
                              p["sw"], p["ph"], p["pw"])
    if sh != 1 or sw != 1 or (kh == 1 and kw == 1):
        return _conv_mm_impl(x, p["w"], p["bias"], kh, kw, sh, sw, ph, pw)
    # Stride-1 spatial conv.
    C = x.shape[-1]
    if kh > 1 and kw > 1:
        # Small-C square kernels: explicit im2col (K = kh*kw*C) fills the MXU
        # contraction better than the merged K = kw*C, and the patch blowup is
        # tiny at these spatial sizes.
        patch_bytes = ((x.shape[1] + 2 * ph) * (x.shape[2] + 2 * pw)
                       * kh * kw * C * 2)
        if C * kw < 256 and patch_bytes <= 4 * 1024 * 1024:
            return _conv_mm_impl(x, p["w"], p["bias"], kh, kw, 1, 1, ph, pw)
    # Implicit im2col flat conv; (k,1) kernels are transposed to (1,k) so the
    # kw in-row taps always merge into K = kw*C matmuls.
    return _conv_flat_impl(x, p["w"], p["bias"], kh, kw, ph, pw,
                           transpose_hw=(kh > 1 and kw == 1))


# ----------------------------------------------------------------------------
# Pooling helper (glue).
# TODO(synk): the 3x3/2 max-pool uses lax.reduce_window rather than a Pallas
#             kernel; all MAC hot paths (convolutions, avgpool-as-conv, GAP)
#             are in Pallas.
# ----------------------------------------------------------------------------
def max_pool_3x3_s2(x):
    init = jnp.array(-jnp.inf, dtype=x.dtype)
    return lax.reduce_window(x, init, lax.max,
                             (1, 3, 3, 1), (1, 2, 2, 1), "VALID")


# ----------------------------------------------------------------------------
# Deterministic parameter construction (BasicConv2d = Conv + BN(eval) + ReLU)
# ----------------------------------------------------------------------------
class KeyGen:
    def __init__(self, key):
        self.key = key

    def __call__(self):
        self.key, sub = jax.random.split(self.key)
        return sub


def make_conv(kg, cin, cout, k, stride=1, pad=0):
    kh, kw = (k, k) if isinstance(k, int) else k
    sh, sw = (stride, stride) if isinstance(stride, int) else stride
    ph, pw = (pad, pad) if isinstance(pad, int) else pad
    fan_in = kh * kw * cin
    w = jax.random.normal(kg(), (kh, kw, cin, cout), jnp.float32) * math.sqrt(2.0 / fan_in)
    gamma = 1.0 + 0.1 * jax.random.normal(kg(), (cout,), jnp.float32)
    beta = 0.01 * jax.random.normal(kg(), (cout,), jnp.float32)
    # BN eval-mode (running_mean=0, running_var=1, eps=1e-3) folded into w/bias.
    scale = gamma / jnp.sqrt(jnp.float32(1.0 + 1e-3))
    w = (w * scale).reshape(fan_in, cout).astype(jnp.bfloat16)
    return dict(w=w, bias=beta.astype(jnp.float32),
                kh=kh, kw=kw, sh=sh, sw=sw, ph=ph, pw=pw)


def fuse_1x1(convs):
    """Fuse several 1x1/stride-1/no-pad convs on the same input into one."""
    for c in convs:
        assert c["kh"] == 1 and c["kw"] == 1 and c["sh"] == 1 and c["sw"] == 1
        assert c["ph"] == 0 and c["pw"] == 0
    return dict(w=jnp.concatenate([c["w"] for c in convs], axis=1),
                bias=jnp.concatenate([c["bias"] for c in convs], axis=0),
                kh=1, kw=1, sh=1, sw=1, ph=0, pw=0)


def fuse_avgpool_1x1(conv1x1):
    """Fold AvgPool2d(3, stride=1, pad=1, count_include_pad=True) followed by
    a 1x1 BasicConv2d into one 3x3 conv whose 9 taps are all w/9 (exact)."""
    w = conv1x1["w"].astype(jnp.float32) / 9.0          # (C, N)
    C, N = w.shape
    w9 = jnp.tile(w[None], (9, 1, 1)).reshape(9 * C, N).astype(jnp.bfloat16)
    return dict(w=w9, bias=conv1x1["bias"],
                kh=3, kw=3, sh=1, sw=1, ph=1, pw=1)


def _split_channels(x, sizes):
    outs, off = [], 0
    for s in sizes:
        outs.append(x[..., off:off + s])
        off += s
    return outs


def make_inception_a(kg, cin, pool_features):
    b1 = make_conv(kg, cin, 64, 1)
    b5_1 = make_conv(kg, cin, 48, 1)
    b3d_1 = make_conv(kg, cin, 64, 1)
    return dict(
        head=fuse_1x1([b1, b5_1, b3d_1]), head_splits=(64, 48, 64),
        b5_2=make_conv(kg, 48, 64, 5, pad=2),
        b3d_2=make_conv(kg, 64, 96, 3, pad=1),
        b3d_3=make_conv(kg, 96, 96, 3, pad=1),
        bp=fuse_avgpool_1x1(make_conv(kg, cin, pool_features, 1)))


def make_inception_b(kg, cin):
    return dict(
        b3=make_conv(kg, cin, 384, 3, stride=2),
        b3d_1=make_conv(kg, cin, 64, 1),
        b3d_2=make_conv(kg, 64, 96, 3, pad=1),
        b3d_3=make_conv(kg, 96, 96, 3, stride=2))


def make_inception_c(kg, cin, c7):
    b1 = make_conv(kg, cin, 192, 1)
    b7_1 = make_conv(kg, cin, c7, 1)
    b7d_1 = make_conv(kg, cin, c7, 1)
    return dict(
        head=fuse_1x1([b1, b7_1, b7d_1]), head_splits=(192, c7, c7),
        b7_2=make_conv(kg, c7, c7, (1, 7), pad=(0, 3)),
        b7_3=make_conv(kg, c7, 192, (7, 1), pad=(3, 0)),
        b7d_2=make_conv(kg, c7, c7, (7, 1), pad=(3, 0)),
        b7d_3=make_conv(kg, c7, c7, (1, 7), pad=(0, 3)),
        b7d_4=make_conv(kg, c7, c7, (7, 1), pad=(3, 0)),
        b7d_5=make_conv(kg, c7, 192, (1, 7), pad=(0, 3)),
        bp=fuse_avgpool_1x1(make_conv(kg, cin, 192, 1)))


def make_inception_d(kg, cin):
    b3_1 = make_conv(kg, cin, 192, 1)
    b7_1 = make_conv(kg, cin, 192, 1)
    return dict(
        head=fuse_1x1([b3_1, b7_1]), head_splits=(192, 192),
        b3_2=make_conv(kg, 192, 320, 3, stride=2),
        b7_2=make_conv(kg, 192, 192, (1, 7), pad=(0, 3)),
        b7_3=make_conv(kg, 192, 192, (7, 1), pad=(3, 0)),
        b7_4=make_conv(kg, 192, 192, 3, stride=2))


def make_inception_e(kg, cin):
    b1 = make_conv(kg, cin, 320, 1)
    b3_1 = make_conv(kg, cin, 384, 1)
    b3d_1 = make_conv(kg, cin, 448, 1)
    return dict(
        head=fuse_1x1([b1, b3_1, b3d_1]), head_splits=(320, 384, 448),
        b3_2a=make_conv(kg, 384, 384, (1, 3), pad=(0, 1)),
        b3_2b=make_conv(kg, 384, 384, (3, 1), pad=(1, 0)),
        b3d_2=make_conv(kg, 448, 384, 3, pad=1),
        b3d_3a=make_conv(kg, 384, 384, (1, 3), pad=(0, 1)),
        b3d_3b=make_conv(kg, 384, 384, (3, 1), pad=(1, 0)),
        bp=fuse_avgpool_1x1(make_conv(kg, cin, 192, 1)))


def build_params(seed=0):
    kg = KeyGen(jax.random.PRNGKey(seed))
    P = {}
    # Block 0
    P["conv1a"] = make_conv(kg, 3, 32, 3, stride=2)
    P["conv2a"] = make_conv(kg, 32, 32, 3)
    P["conv2b"] = make_conv(kg, 32, 64, 3, pad=1)
    # Block 1
    P["conv3b"] = make_conv(kg, 64, 80, 1)
    P["conv4a"] = make_conv(kg, 80, 192, 3)
    # Block 2
    P["mixed5b"] = make_inception_a(kg, 192, 32)
    P["mixed5c"] = make_inception_a(kg, 256, 64)
    P["mixed5d"] = make_inception_a(kg, 288, 64)
    P["mixed6a"] = make_inception_b(kg, 288)
    P["mixed6b"] = make_inception_c(kg, 768, 128)
    P["mixed6c"] = make_inception_c(kg, 768, 160)
    P["mixed6d"] = make_inception_c(kg, 768, 160)
    P["mixed6e"] = make_inception_c(kg, 768, 192)
    # Block 3
    P["mixed7a"] = make_inception_d(kg, 768)
    P["mixed7b"] = make_inception_e(kg, 1280)
    P["mixed7c"] = make_inception_e(kg, 2048)
    return P


# ----------------------------------------------------------------------------
# Mixed-block apply functions (concat order matches torchvision)
# ----------------------------------------------------------------------------
def apply_inception_a(x, p):
    h1, h5, h3 = _split_channels(apply_conv(x, p["head"]), p["head_splits"])
    b5 = apply_conv(h5, p["b5_2"])
    b3 = apply_conv(apply_conv(h3, p["b3d_2"]), p["b3d_3"])
    bp = apply_conv(x, p["bp"])          # avgpool(3,1,1) folded into the conv
    return jnp.concatenate([h1, b5, b3, bp], axis=-1)


def apply_inception_b(x, p):
    b3 = apply_conv(x, p["b3"])
    b3d = apply_conv(apply_conv(apply_conv(x, p["b3d_1"]), p["b3d_2"]), p["b3d_3"])
    bp = max_pool_3x3_s2(x)
    return jnp.concatenate([b3, b3d, bp], axis=-1)


def apply_inception_c(x, p):
    h1, h7, h7d = _split_channels(apply_conv(x, p["head"]), p["head_splits"])
    b7 = apply_conv(apply_conv(h7, p["b7_2"]), p["b7_3"])
    b7d = h7d
    for name in ("b7d_2", "b7d_3", "b7d_4", "b7d_5"):
        b7d = apply_conv(b7d, p[name])
    bp = apply_conv(x, p["bp"])          # avgpool(3,1,1) folded into the conv
    return jnp.concatenate([h1, b7, b7d, bp], axis=-1)


def apply_inception_d(x, p):
    h3, h7 = _split_channels(apply_conv(x, p["head"]), p["head_splits"])
    b3 = apply_conv(h3, p["b3_2"])
    b7 = h7
    for name in ("b7_2", "b7_3", "b7_4"):
        b7 = apply_conv(b7, p[name])
    bp = max_pool_3x3_s2(x)
    return jnp.concatenate([b3, b7, bp], axis=-1)


def apply_inception_e(x, p):
    h1, h3, h3d = _split_channels(apply_conv(x, p["head"]), p["head_splits"])
    b3 = jnp.concatenate([apply_conv(h3, p["b3_2a"]),
                          apply_conv(h3, p["b3_2b"])], axis=-1)
    t = apply_conv(h3d, p["b3d_2"])
    b3d = jnp.concatenate([apply_conv(t, p["b3d_3a"]),
                           apply_conv(t, p["b3d_3b"])], axis=-1)
    bp = apply_conv(x, p["bp"])          # avgpool(3,1,1) folded into the conv
    return jnp.concatenate([h1, b3, b3d, bp], axis=-1)


# ----------------------------------------------------------------------------
# Full forward pass (mirrors InceptionV3.forward)
# ----------------------------------------------------------------------------
def inception_v3_forward(inp_nchw, params, output_blocks=(3,),
                         resize_input=True, normalize_input=True):
    output_blocks = sorted(output_blocks)
    last_needed = max(output_blocks)
    assert last_needed <= 3
    outp = []
    x = inp_nchw
    if resize_input:
        B, C = x.shape[0], x.shape[1]
        # F.interpolate(..., size=(299,299), mode='bilinear', align_corners=False)
        # (no anti-aliasing, matching the PyTorch reference)
        x = jax.image.resize(x, (B, C, 299, 299), method="bilinear",
                             antialias=False)
    if normalize_input:
        x = 2.0 * x - 1.0
    x = jnp.transpose(x, (0, 2, 3, 1))  # NCHW -> NHWC (internal layout)

    def to_nchw(t):
        return jnp.transpose(t, (0, 3, 1, 2)).astype(jnp.float32)

    # Block 0: Conv2d_1a_3x3, Conv2d_2a_3x3, Conv2d_2b_3x3, MaxPool(3,2)
    x = apply_conv(x, params["conv1a"])
    x = apply_conv(x, params["conv2a"])
    x = apply_conv(x, params["conv2b"])
    x = max_pool_3x3_s2(x)
    if 0 in output_blocks:
        outp.append(to_nchw(x))
    if last_needed == 0:
        return outp

    # Block 1: Conv2d_3b_1x1, Conv2d_4a_3x3, MaxPool(3,2)
    x = apply_conv(x, params["conv3b"])
    x = apply_conv(x, params["conv4a"])
    x = max_pool_3x3_s2(x)
    if 1 in output_blocks:
        outp.append(to_nchw(x))
    if last_needed == 1:
        return outp

    # Block 2: Mixed_5b..5d, Mixed_6a..6e
    x = apply_inception_a(x, params["mixed5b"])
    x = apply_inception_a(x, params["mixed5c"])
    x = apply_inception_a(x, params["mixed5d"])
    x = apply_inception_b(x, params["mixed6a"])
    x = apply_inception_c(x, params["mixed6b"])
    x = apply_inception_c(x, params["mixed6c"])
    x = apply_inception_c(x, params["mixed6d"])
    x = apply_inception_c(x, params["mixed6e"])
    if 2 in output_blocks:
        outp.append(to_nchw(x))
    if last_needed == 2:
        return outp

    # Block 3: Mixed_7a..7c, AdaptiveAvgPool2d((1,1))
    x = apply_inception_d(x, params["mixed7a"])
    x = apply_inception_e(x, params["mixed7b"])
    x = apply_inception_e(x, params["mixed7c"])
    x = global_avg_pool(x)              # Pallas reduction -> (B, 2048) f32
    x = x[:, :, None, None]             # (B, 2048, 1, 1) NCHW like PyTorch
    if 3 in output_blocks:
        outp.append(x)
    return outp


if __name__ == "__main__":
    key = jax.random.PRNGKey(0)
    # Bx3xHxW input, values in (0, 1) as the docstring requires.
    x = jax.random.uniform(key, (2, 3, 16, 16), dtype=jnp.float32)

    params = build_params(seed=0)
    feats = inception_v3_forward(x, params)  # default output_blocks=[3]
    feats = [jax.block_until_ready(f) for f in feats]

    assert len(feats) == 1
    assert feats[0].shape == (2, 2048, 1, 1), feats[0].shape
    assert bool(jnp.all(jnp.isfinite(feats[0])))
    print("KERNEL_OK")
</pallas_src>

<mosaic_0001>
module attributes {stable_mosaic.version = 11 : i64} {
  func.func @_mm_bias_relu_kernel(%arg0: i32, %arg1: memref<512x27xbf16, #tpu.memory_space<vmem>>, %arg2: memref<27x32xbf16, #tpu.memory_space<vmem>>, %arg3: memref<1x32xf32, #tpu.memory_space<vmem>>, %arg4: memref<512x32xbf16, #tpu.memory_space<vmem>>) attributes {dimension_semantics = [#tpu.dimension_semantics<parallel>], iteration_bounds = array<i64: 87>, scalar_prefetch = 0 : i64, scratch_operands = 0 : i64, tpu.core_type = #tpu.core_type<tc>, window_params = [{transform_indices = @transform_0, window_bounds = array<i64: 512, 27>}, {pipeline_mode = #tpu.pipeline_mode<synchronous>, transform_indices = @transform_1, window_bounds = array<i64: 27, 32>}, {pipeline_mode = #tpu.pipeline_mode<synchronous>, transform_indices = @transform_2, window_bounds = array<i64: 1, 32>}, {transform_indices = @transform_3, window_bounds = array<i64: 512, 32>}]} {
    %c0 = arith.constant 0 : index
    %c0_0 = arith.constant 0 : index
    %0 = vector.load %arg1[%c0, %c0_0] : memref<512x27xbf16, #tpu.memory_space<vmem>>, vector<512x27xbf16>
    %c0_1 = arith.constant 0 : index
    %c0_2 = arith.constant 0 : index
    %1 = vector.load %arg2[%c0_1, %c0_2] : memref<27x32xbf16, #tpu.memory_space<vmem>>, vector<27x32xbf16>
    %cst = arith.constant dense<0.000000e+00> : vector<512x32xf32>
    %2 = tpu.matmul %0, %1, %cst {dimension_numbers = #tpu.dot_dimension_numbers<[1], [0], [0], [1], [0, 0, 1, 1], [], []>} : vector<512x27xbf16>, vector<27x32xbf16>, vector<512x32xf32> -> vector<512x32xf32>
    %c0_3 = arith.constant 0 : index
    %c0_4 = arith.constant 0 : index
    %3 = vector.load %arg3[%c0_3, %c0_4] : memref<1x32xf32, #tpu.memory_space<vmem>>, vector<1x32xf32>
    %4 = vector.broadcast %3 : vector<1x32xf32> to vector<512x32xf32>
    %5 = arith.addf %2, %4 : vector<512x32xf32>
    %cst_5 = arith.constant 0.000000e+00 : f32
    %6 = vector.broadcast %cst_5 : f32 to vector<512x32xf32>
    %7 = arith.maximumf %5, %6 : vector<512x32xf32>
    %8 = arith.truncf %7 : vector<512x32xf32> to vector<512x32xbf16>
    %c0_6 = arith.constant 0 : index
    %c0_7 = arith.constant 0 : index
    %9 = vector.load %arg4[%c0_6, %c0_7] : memref<512x32xbf16, #tpu.memory_space<vmem>>, vector<512x32xbf16>
    tpu.vector_store %arg4[%c0_6, %c0_7], %8 {strides = array<i32>} : memref<512x32xbf16, #tpu.memory_space<vmem>>, vector<512x32xbf16>,
    return
  }
  func.func @transform_0(%arg0: i32) -> (i32, i32) {
    %c0_i32 = arith.constant 0 : i32
    %c0_i32_0 = arith.constant 0 : i32
    return %arg0, %c0_i32 : i32, i32
  }
  func.func @transform_1(%arg0: i32) -> (i32, i32) {
    %c0_i32 = arith.constant 0 : i32
    %c0_i32_0 = arith.constant 0 : i32
    %c0_i32_1 = arith.constant 0 : i32
    return %c0_i32, %c0_i32_0 : i32, i32
  }
  func.func @transform_2(%arg0: i32) -> (i32, i32) {
    %c0_i32 = arith.constant 0 : i32
    %c0_i32_0 = arith.constant 0 : i32
    %c0_i32_1 = arith.constant 0 : i32
    return %c0_i32, %c0_i32_0 : i32, i32
  }
  func.func @transform_3(%arg0: i32) -> (i32, i32) {
    %c0_i32 = arith.constant 0 : i32
    %c0_i32_0 = arith.constant 0 : i32
    return %arg0, %c0_i32 : i32, i32
  }
}

</mosaic_0001>

<bundles_post_ra>
// kernel: _conv_mm_impl.1
= control target key start
LH: loop header
LB: loop body
LE: loop exit
PB: predicated region body
PF: predicated region fallthrough
CT: control target
= control target key end

     0   :  { %s1639_s12 = smov 0   ;;  %s1934_s0 = inlined_call_operand.vmem [shape: bf16[44544,27], index: 0, kind: input, shape index: {}]   ;;  %s1935_s1 = inlined_call_operand.vmem [shape: bf16[27,32], index: 1, kind: input, shape index: {}]   ;;  %s1936_s2 = inlined_call_operand.vmem [shape: f32[1,32], index: 2, kind: input, shape index: {}]   ;;  %s1937_s3 = inlined_call_operand.vmem [shape: bf16[44544,32], index: 3, kind: output, shape index: {}]  }
   0x1 LB: > { %s1255_s13 = sadd.s32 4294967295, %s1616_s12   ;;  %p1259_p0 = scmp.ge.s32.totalorder %s1616_s12, 1  ;;  %s1616_s12 = sphi %s1639_s12, %s13_s12  }
   0x2   : > { %p138_p1 = scmp.lt.s32.totalorder %s1616_s12, 88 }
   0x4   : > { %p139_p2 = pnand %p1259_p0, %p138_p1 }
   0x5   : > { %s1260_s16 = sshll.u32 (!%p139_p2), %s1255_s13, 6 }
   0x6   : > { %142 = sbr.rel (%p139_p2) target bundleno = 286 (0x11e), region = 32  ;;  %p163_p3 = scmp.lt.s32.totalorder (!%p139_p2), %s1260_s16, 5567 }
   0xb   : > { %v1576_v0 = vld [vmem:[%s1935_s1 + $0x8] sm:$0x3f]   ;;  %vm518_vm0 = vcmask 1044480   ;;  %vm519_vm1 = vcmask 1045504   ;;  %v1618_v1 = vmov 65535   ;;  %v1577_v5 = vld [vmem:[%s1935_s1] sm:$0xff]  }
   0xc   : > { %v520_v2 = vsel %vm518_vm0, 4294967295, %v1618_v1  ;;  %s1939_s16 = smov (!%p163_p3, %s1260_s16), 5567  ;;  %vm421_vm2 = vcmask 220160   ;;  %v1730_v38 = vld [vmem:[%s1936_s2] ss:$0 sm:$0xff]  ;;  %vm1134_vm3 = vcmask 257024  }
   0xd   : > { %v521_v3 = vsel %vm519_vm1, %v520_v2, 0  ;;  %s1261_s19 = sshll.u32 %s1939_s16, 2 }
   0xe   : > { %v523_v4 = vand.u32 %v1576_v0, %v521_v3  ;;  %s1661_s22 = scalar_lea.vmem %s1934_s0, %s1261_s19  ;;  %s1741_s27 = scalar_lea.vmem %s1937_s3, %s1261_s19 }
   0xf   : > { %v1578_v6 = vld [vmem:[%s1661_s22] sm:$0xff]   ;;  %v1580_v8 = vld [vmem:[%s1661_s22 + $0x8] sm:$0xff]   ;;  %v1582_v10 = vld [vmem:[%s1661_s22 + $0x10] sm:$0xff]  }
  0x10   : > { %1495 = vmatprep.subr.bf16.mxu0 %v523_v4  ;;  %1563 = vmatprep.subr.bf16.mxu1 %v523_v4  ;;  %v1579_v7 = vld [vmem:[%s1661_s22 + $0x80] sm:$0xff]   ;;  %v1581_v9 = vld [vmem:[%s1661_s22 + $0x88] sm:$0xff]   ;;  %v1583_v11 = vld [vmem:[%s1661_s22 + $0x90] sm:$0xff]  }
  0x11   : > { %1496 = vmatpush3.bf16.msra.mxu0 %v523_v4  ;;  %1565 = vmatpush3.bf16.msra.mxu1 %v523_v4  ;;  %v1584_v12 = vld [vmem:[%s1661_s22 + $0x18] sm:$0xff]   ;;  %v1586_v14 = vld [vmem:[%s1661_s22 + $0x20] sm:$0xff]   ;;  %v1588_v16 = vld [vmem:[%s1661_s22 + $0x28] sm:$0xff]  }
  0x12   : > { %1497 = vmatprep.subr.bf16.mxu0 %v1577_v5  ;;  %1564 = vmatprep.subr.bf16.mxu1 %v1577_v5  ;;  %v1585_v13 = vld [vmem:[%s1661_s22 + $0x98] sm:$0xff]   ;;  %v1587_v15 = vld [vmem:[%s1661_s22 + $0xa0] sm:$0xff]   ;;  %v1589_v17 = vld [vmem:[%s1661_s22 + $0xa8] sm:$0xff]  }
  0x13   : > { %1499 = vmatprep.mubr.msk.bf16.mxu0 %vm421_vm2, %v1578_v6  ;;  %1531 = vmatprep.mubr.msk.bf16.mxu1 %vm421_vm2, %v1579_v7  ;;  %v1590_v18 = vld [vmem:[%s1661_s22 + $0x30] sm:$0xff]   ;;  %v1592_v20 = vld [vmem:[%s1661_s22 + $0x38] sm:$0xff]   ;;  %v1594_v22 = vld [vmem:[%s1661_s22 + $0x40] sm:$0xff]  }
  0x14   : > { %v1591_v19 = vld [vmem:[%s1661_s22 + $0xb0] sm:$0xff]   ;;  %v1593_v21 = vld [vmem:[%s1661_s22 + $0xb8] sm:$0xff]   ;;  %v1595_v23 = vld [vmem:[%s1661_s22 + $0xc0] sm:$0xff]  }
  0x15   : > { %1498 = vmatpush3.bf16.msra.mxu0 %v1577_v5  ;;  %1566 = vmatpush3.bf16.msra.mxu1 %v1577_v5  ;;  %v1596_v24 = vld [vmem:[%s1661_s22 + $0x48] sm:$0xff]   ;;  %v1598_v26 = vld [vmem:[%s1661_s22 + $0x50] sm:$0xff]   ;;  %v1600_v28 = vld [vmem:[%s1661_s22 + $0x58] sm:$0xff]  }
  0x16   : > { %v1597_v25 = vld [vmem:[%s1661_s22 + $0xc8] sm:$0xff]   ;;  %v1599_v27 = vld [vmem:[%s1661_s22 + $0xd0] sm:$0xff]   ;;  %v1601_v29 = vld [vmem:[%s1661_s22 + $0xd8] sm:$0xff]  }
  0x17   : > { %v1602_v30 = vld [vmem:[%s1661_s22 + $0x60] sm:$0xff]   ;;  %v1604_v32 = vld [vmem:[%s1661_s22 + $0x68] sm:$0xff]   ;;  %v1606_v34 = vld [vmem:[%s1661_s22 + $0x70] sm:$0xff]  }
  0x18   : > { %1500 = vmatmul.mubr.msk.bf16.vlgmr.msra.gmra.mxu0 %vm421_vm2, %v1580_v8  ;;  %1532 = vmatmul.mubr.msk.bf16.vlgmr.msra.gmra.mxu1 %vm421_vm2, %v1581_v9  ;;  %v1603_v31 = vld [vmem:[%s1661_s22 + $0xe0] sm:$0xff]   ;;  %v1605_v33 = vld [vmem:[%s1661_s22 + $0xe8] sm:$0xff]   ;;  %v1607_v35 = vld [vmem:[%s1661_s22 + $0xf0] sm:$0xff]  }
  0x19   : > { %1503 = vmatprep.mubr.msk.bf16.mxu0 %vm421_vm2, %v1582_v10  ;;  %1535 = vmatprep.mubr.msk.bf16.mxu1 %vm421_vm2, %v1583_v11  ;;  %v1608_v36 = vld [vmem:[%s1661_s22 + $0x78] sm:$0xff]  }
  0x1a   : > { %v1609_v37 = vld [vmem:[%s1661_s22 + $0xf8] sm:$0xff]  }
  0x20   : > { %1504 = vmatmul.mubr.msk.bf16.gmra.mxu0 %vm421_vm2, %v1584_v12  ;;  %1536 = vmatmul.mubr.msk.bf16.gmra.mxu1 %vm421_vm2, %v1585_v13 }
  0x21   : > { %1507 = vmatprep.mubr.msk.bf16.mxu0 %vm421_vm2, %v1586_v14  ;;  %1539 = vmatprep.mubr.msk.bf16.mxu1 %vm421_vm2, %v1587_v15 }
  0x28   : > { %1508 = vmatmul.mubr.msk.bf16.gmra.mxu0 %vm421_vm2, %v1588_v16  ;;  %1540 = vmatmul.mubr.msk.bf16.gmra.mxu1 %vm421_vm2, %v1589_v17 }
  0x29   : > { %1511 = vmatprep.mubr.msk.bf16.mxu0 %vm421_vm2, %v1590_v18  ;;  %1543 = vmatprep.mubr.msk.bf16.mxu1 %vm421_vm2, %v1591_v19 }
  0x30   : > { %1512 = vmatmul.mubr.msk.bf16.gmra.mxu0 %vm421_vm2, %v1592_v20  ;;  %1544 = vmatmul.mubr.msk.bf16.gmra.mxu1 %vm421_vm2, %v1593_v21 }
  0x31   : > { %1515 = vmatprep.mubr.msk.bf16.mxu0 %vm421_vm2, %v1594_v22  ;;  %1547 = vmatprep.mubr.msk.bf16.mxu1 %vm421_vm2, %v1595_v23 }
  0x38   : > { %1516 = vmatmul.mubr.msk.bf16.gmra.mxu0 %vm421_vm2, %v1596_v24  ;;  %1548 = vmatmul.mubr.msk.bf16.gmra.mxu1 %vm421_vm2, %v1597_v25 }
  0x39   : > { %1519 = vmatprep.mubr.msk.bf16.mxu0 %vm421_vm2, %v1598_v26  ;;  %1551 = vmatprep.mubr.msk.bf16.mxu1 %vm421_vm2, %v1599_v27 }
  0x40   : > { %1520 = vmatmul.mubr.msk.bf16.gmra.mxu0 %vm421_vm2, %v1600_v28  ;;  %1552 = vmatmul.mubr.msk.bf16.gmra.mxu1 %vm421_vm2, %v1601_v29 }
  0x41   : > { %1523 = vmatprep.mubr.msk.bf16.mxu0 %vm421_vm2, %v1602_v30  ;;  %1555 = vmatprep.mubr.msk.bf16.mxu1 %vm421_vm2, %v1603_v31 }
  0x48   : > { %1524 = vmatmul.mubr.msk.bf16.gmra.mxu0 %vm421_vm2, %v1604_v32  ;;  %1556 = vmatmul.mubr.msk.bf16.gmra.mxu1 %vm421_vm2, %v1605_v33 }
  0x49   : > { %1527 = vmatprep.mubr.msk.bf16.mxu0 %vm421_vm2, %v1606_v34  ;;  %1559 = vmatprep.mubr.msk.bf16.mxu1 %vm421_vm2, %v1607_v35 }
  0x50   : > { %1528 = vmatmul.mubr.msk.bf16.gmra.mxu0 %vm421_vm2, %v1608_v36  ;;  %1560 = vmatmul.mubr.msk.bf16.gmra.mxu1 %vm421_vm2, %v1609_v37 }
  0xd8   : > { %v1501_v39 = vpop.f32.mrf.mxu0  ;;  %v1533_v40 = vpop.f32.mrf.mxu1 }
  0xd9   : > { %v568_v41 = vadd.f32 %v1501_v39, %v1730_v38  ;;  %v696_v42 = vadd.f32 %v1533_v40, %v1730_v38 }
  0xda   : > { %v559_v43 = vpop.f32.mrf.mxu0  ;;  %v687_v44 = vpop.f32.mrf.mxu1 }
  0xdb   : > { %v816_v45 = vmax.f32 %v568_v41, 0.0  ;;  %v848_v46 = vmax.f32 %v696_v42, 0.0  ;;  %v560_v47 = vadd.f32 %v1730_v38, %v559_v43  ;;  %v688_v48 = vadd.f32 %v1730_v38, %v687_v44 }
  0xdc   : > { %v1502_v49 = vpop.f32.mrf.mxu0  ;;  %v1534_v50 = vpop.f32.mrf.mxu1 }
  0xdd   : > { %v1399_v51 = vpack.c.bf16 %v816_v45, %v816_v45  ;;  %v1431_v52 = vpack.c.bf16 %v848_v46, %v848_v46  ;;  %v814_v53 = vmax.f32 %v560_v47, 0.0  ;;  %v846_v54 = vmax.f32 %v688_v48, 0.0 }
  0xde   : > { %v571_v55 = vadd.f32 %v1502_v49, %v1730_v38  ;;  %v699_v56 = vadd.f32 %v1534_v50, %v1730_v38  ;;  %v562_v57 = vpop.f32.mrf.mxu0  ;;  %v690_v58 = vpop.f32.mrf.mxu1 }
  0xdf   : > { %1137 = vst.msk [vmem:[%s1741_s27 + $0x8] sm:$0xf] %vm1134_vm3, %v1399_v51  ;;  %1169 = vst.msk [vmem:[%s1741_s27 + $0x88] sm:$0xf] %vm1134_vm3, %v1431_v52  ;;  %v1397_v59 = vpack.c.bf16 %v814_v53, %v814_v53  ;;  %v1429_v60 = vpack.c.bf16 %v846_v54, %v846_v54  ;;  %v563_v61 = vadd.f32 %v1730_v38, %v562_v57 }
  0xe0   : > { %v691_v62 = vadd.f32 %v1730_v38, %v690_v58  ;;  %v817_v63 = vmax.f32 %v571_v55, 0.0  ;;  %v849_v0 = vmax.f32 %v699_v56, 0.0  ;;  %v1505_v1 = vpop.f32.mrf.mxu0  ;;  %v1537_v2 = vpop.f32.mrf.mxu1 }
  0xe1   : > { %1135 = vst.msk [vmem:[%s1741_s27] sm:$0xf] %vm1134_vm3, %v1397_v59  ;;  %1167 = vst.msk [vmem:[%s1741_s27 + $0x80] sm:$0xf] %vm1134_vm3, %v1429_v60  ;;  %v815_v3 = vmax.f32 %v563_v61, 0.0  ;;  %v584_v5 = vadd.f32 %v1505_v1, %v1730_v38  ;;  %v712_v6 = vadd.f32 %v1537_v2, %v1730_v38 }
  0xe2   : > { %v847_v4 = vmax.f32 %v691_v62, 0.0  ;;  %v1400_v7 = vpack.c.bf16 %v817_v63, %v817_v63  ;;  %v1432_v8 = vpack.c.bf16 %v849_v0, %v849_v0  ;;  %v575_v9 = vpop.f32.mrf.mxu0  ;;  %v703_v10 = vpop.f32.mrf.mxu1 }
  0xe3   : > { %v1398_v11 = vpack.c.bf16 %v815_v3, %v815_v3  ;;  %v820_v13 = vmax.f32 %v584_v5, 0.0  ;;  %v852_v14 = vmax.f32 %v712_v6, 0.0  ;;  %v576_v15 = vadd.f32 %v1730_v38, %v575_v9 }
  0xe4   : > { %v1430_v12 = vpack.c.bf16 %v847_v4, %v847_v4  ;;  %1138 = vst.msk [vmem:[%s1741_s27 + $0xc] sm:$0xf] %vm1134_vm3, %v1400_v7  ;;  %1170 = vst.msk [vmem:[%s1741_s27 + $0x8c] sm:$0xf] %vm1134_vm3, %v1432_v8  ;;  %v704_v16 = vadd.f32 %v1730_v38, %v703_v10  ;;  %v1506_v17 = vpop.f32.mrf.mxu0  ;;  %v1538_v18 = vpop.f32.mrf.mxu1 }
  0xe5   : > { %1136 = vst.msk [vmem:[%s1741_s27 + $0x4] sm:$0xf] %vm1134_vm3, %v1398_v11  ;;  %v1403_v19 = vpack.c.bf16 %v820_v13, %v820_v13  ;;  %v1435_v20 = vpack.c.bf16 %v852_v14, %v852_v14  ;;  %v587_v21 = vadd.f32 %v1506_v17, %v1730_v38  ;;  %v715_v22 = vadd.f32 %v1538_v18, %v1730_v38 }
  0xe6   : > { %1168 = vst.msk [vmem:[%s1741_s27 + $0x84] sm:$0xf] %vm1134_vm3, %v1430_v12  ;;  %v818_v23 = vmax.f32 %v576_v15, 0.0  ;;  %v850_v24 = vmax.f32 %v704_v16, 0.0  ;;  %v578_v25 = vpop.f32.mrf.mxu0  ;;  %v706_v26 = vpop.f32.mrf.mxu1 }
  0xe7   : > { %1141 = vst.msk [vmem:[%s1741_s27 + $0x18] sm:$0xf] %vm1134_vm3, %v1403_v19  ;;  %1173 = vst.msk [vmem:[%s1741_s27 + $0x98] sm:$0xf] %vm1134_vm3, %v1435_v20  ;;  %v821_v27 = vmax.f32 %v587_v21, 0.0  ;;  %v853_v28 = vmax.f32 %v715_v22, 0.0  ;;  %v579_v29 = vadd.f32 %v1730_v38, %v578_v25  ;;  %v707_v30 = vadd.f32 %v1730_v38, %v706_v26 }
  0xe8   : > { %v1401_v31 = vpack.c.bf16 %v818_v23, %v818_v23  ;;  %v1433_v32 = vpack.c.bf16 %v850_v24, %v850_v24  ;;  %v1509_v33 = vpop.f32.mrf.mxu0  ;;  %v1541_v34 = vpop.f32.mrf.mxu1 }
  0xe9   : > { %v1404_v35 = vpack.c.bf16 %v821_v27, %v821_v27  ;;  %v1436_v36 = vpack.c.bf16 %v853_v28, %v853_v28  ;;  %v819_v37 = vmax.f32 %v579_v29, 0.0  ;;  %v851_v39 = vmax.f32 %v707_v30, 0.0 }
  0xea   : > { %1139 = vst.msk [vmem:[%s1741_s27 + $0x10] sm:$0xf] %vm1134_vm3, %v1401_v31  ;;  %1171 = vst.msk [vmem:[%s1741_s27 + $0x90] sm:$0xf] %vm1134_vm3, %v1433_v32  ;;  %v600_v40 = vadd.f32 %v1509_v33, %v1730_v38  ;;  %v728_v41 = vadd.f32 %v1541_v34, %v1730_v38  ;;  %v591_v42 = vpop.f32.mrf.mxu0  ;;  %v719_v43 = vpop.f32.mrf.mxu1 }
  0xeb   : > { %1142 = vst.msk [vmem:[%s1741_s27 + $0x1c] sm:$0xf] %vm1134_vm3, %v1404_v35  ;;  %1174 = vst.msk [vmem:[%s1741_s27 + $0x9c] sm:$0xf] %vm1134_vm3, %v1436_v36  ;;  %v1402_v44 = vpack.c.bf16 %v819_v37, %v819_v37  ;;  %v1434_v45 = vpack.c.bf16 %v851_v39, %v851_v39  ;;  %v592_v46 = vadd.f32 %v1730_v38, %v591_v42 }
  0xec   : > { %v720_v47 = vadd.f32 %v1730_v38, %v719_v43  ;;  %v824_v48 = vmax.f32 %v600_v40, 0.0  ;;  %v856_v49 = vmax.f32 %v728_v41, 0.0  ;;  %v1510_v50 = vpop.f32.mrf.mxu0  ;;  %v1542_v51 = vpop.f32.mrf.mxu1 }
  0xed   : > { %1140 = vst.msk [vmem:[%s1741_s27 + $0x14] sm:$0xf] %vm1134_vm3, %v1402_v44  ;;  %1172 = vst.msk [vmem:[%s1741_s27 + $0x94] sm:$0xf] %vm1134_vm3, %v1434_v45  ;;  %v822_v52 = vmax.f32 %v592_v46, 0.0  ;;  %v603_v54 = vadd.f32 %v1510_v50, %v1730_v38  ;;  %v731_v55 = vadd.f32 %v1542_v51, %v1730_v38 }
  0xee   : > { %v854_v53 = vmax.f32 %v720_v47, 0.0  ;;  %v1407_v56 = vpack.c.bf16 %v824_v48, %v824_v48  ;;  %v1439_v57 = vpack.c.bf16 %v856_v49, %v856_v49  ;;  %v594_v58 = vpop.f32.mrf.mxu0  ;;  %v722_v59 = vpop.f32.mrf.mxu1 }
  0xef   : > { %v1405_v60 = vpack.c.bf16 %v822_v52, %v822_v52  ;;  %v825_v62 = vmax.f32 %v603_v54, 0.0  ;;  %v857_v63 = vmax.f32 %v731_v55, 0.0  ;;  %v595_v0 = vadd.f32 %v1730_v38, %v594_v58 }
  0xf0   : > { %v1437_v61 = vpack.c.bf16 %v854_v53, %v854_v53  ;;  %1145 = vst.msk [vmem:[%s1741_s27 + $0x28] sm:$0xf] %vm1134_vm3, %v1407_v56  ;;  %1177 = vst.msk [vmem:[%s1741_s27 + $0xa8] sm:$0xf] %vm1134_vm3, %v1439_v57  ;;  %v723_v1 = vadd.f32 %v1730_v38, %v722_v59  ;;  %v1513_v2 = vpop.f32.mrf.mxu0  ;;  %v1545_v3 = vpop.f32.mrf.mxu1 }
  0xf1   : > { %1143 = vst.msk [vmem:[%s1741_s27 + $0x20] sm:$0xf] %vm1134_vm3, %v1405_v60  ;;  %v1408_v4 = vpack.c.bf16 %v825_v62, %v825_v62  ;;  %v1440_v5 = vpack.c.bf16 %v857_v63, %v857_v63  ;;  %v616_v6 = vadd.f32 %v1513_v2, %v1730_v38  ;;  %v744_v7 = vadd.f32 %v1545_v3, %v1730_v38 }
  0xf2   : > { %1175 = vst.msk [vmem:[%s1741_s27 + $0xa0] sm:$0xf] %vm1134_vm3, %v1437_v61  ;;  %v823_v8 = vmax.f32 %v595_v0, 0.0  ;;  %v855_v9 = vmax.f32 %v723_v1, 0.0  ;;  %v607_v10 = vpop.f32.mrf.mxu0  ;;  %v735_v11 = vpop.f32.mrf.mxu1 }
  0xf3   : > { %1146 = vst.msk [vmem:[%s1741_s27 + $0x2c] sm:$0xf] %vm1134_vm3, %v1408_v4  ;;  %1178 = vst.msk [vmem:[%s1741_s27 + $0xac] sm:$0xf] %vm1134_vm3, %v1440_v5  ;;  %v828_v12 = vmax.f32 %v616_v6, 0.0  ;;  %v860_v13 = vmax.f32 %v744_v7, 0.0  ;;  %v608_v14 = vadd.f32 %v1730_v38, %v607_v10  ;;  %v736_v15 = vadd.f32 %v1730_v38, %v735_v11 }
  0xf4   : > { %v1406_v16 = vpack.c.bf16 %v823_v8, %v823_v8  ;;  %v1438_v17 = vpack.c.bf16 %v855_v9, %v855_v9  ;;  %v1514_v18 = vpop.f32.mrf.mxu0  ;;  %v1546_v19 = vpop.f32.mrf.mxu1 }
  0xf5   : > { %v1411_v20 = vpack.c.bf16 %v828_v12, %v828_v12  ;;  %v1443_v21 = vpack.c.bf16 %v860_v13, %v860_v13  ;;  %v826_v22 = vmax.f32 %v608_v14, 0.0  ;;  %v858_v23 = vmax.f32 %v736_v15, 0.0 }
  0xf6   : > { %1144 = vst.msk [vmem:[%s1741_s27 + $0x24] sm:$0xf] %vm1134_vm3, %v1406_v16  ;;  %1176 = vst.msk [vmem:[%s1741_s27 + $0xa4] sm:$0xf] %vm1134_vm3, %v1438_v17  ;;  %v619_v24 = vadd.f32 %v1514_v18, %v1730_v38  ;;  %v747_v25 = vadd.f32 %v1546_v19, %v1730_v38  ;;  %v610_v26 = vpop.f32.mrf.mxu0  ;;  %v738_v27 = vpop.f32.mrf.mxu1 }
  0xf7   : > { %1149 = vst.msk [vmem:[%s1741_s27 + $0x38] sm:$0xf] %vm1134_vm3, %v1411_v20  ;;  %1181 = vst.msk [vmem:[%s1741_s27 + $0xb8] sm:$0xf] %vm1134_vm3, %v1443_v21  ;;  %v1409_v28 = vpack.c.bf16 %v826_v22, %v826_v22  ;;  %v1441_v29 = vpack.c.bf16 %v858_v23, %v858_v23  ;;  %v611_v30 = vadd.f32 %v1730_v38, %v610_v26 }
  0xf8   : > { %v739_v31 = vadd.f32 %v1730_v38, %v738_v27  ;;  %v829_v32 = vmax.f32 %v619_v24, 0.0  ;;  %v861_v33 = vmax.f32 %v747_v25, 0.0  ;;  %v1517_v34 = vpop.f32.mrf.mxu0  ;;  %v1549_v35 = vpop.f32.mrf.mxu1 }
  0xf9   : > { %1147 = vst.msk [vmem:[%s1741_s27 + $0x30] sm:$0xf] %vm1134_vm3, %v1409_v28  ;;  %1179 = vst.msk [vmem:[%s1741_s27 + $0xb0] sm:$0xf] %vm1134_vm3, %v1441_v29  ;;  %v827_v36 = vmax.f32 %v611_v30, 0.0  ;;  %v632_v39 = vadd.f32 %v1517_v34, %v1730_v38  ;;  %v760_v40 = vadd.f32 %v1549_v35, %v1730_v38 }
  0xfa   : > { %v859_v37 = vmax.f32 %v739_v31, 0.0  ;;  %v1412_v41 = vpack.c.bf16 %v829_v32, %v829_v32  ;;  %v1444_v42 = vpack.c.bf16 %v861_v33, %v861_v33  ;;  %v623_v43 = vpop.f32.mrf.mxu0  ;;  %v751_v44 = vpop.f32.mrf.mxu1 }
  0xfb   : > { %v1410_v45 = vpack.c.bf16 %v827_v36, %v827_v36  ;;  %v832_v47 = vmax.f32 %v632_v39, 0.0  ;;  %v864_v48 = vmax.f32 %v760_v40, 0.0  ;;  %v624_v49 = vadd.f32 %v1730_v38, %v623_v43 }
  0xfc   : > { %v1442_v46 = vpack.c.bf16 %v859_v37, %v859_v37  ;;  %1150 = vst.msk [vmem:[%s1741_s27 + $0x3c] sm:$0xf] %vm1134_vm3, %v1412_v41  ;;  %1182 = vst.msk [vmem:[%s1741_s27 + $0xbc] sm:$0xf] %vm1134_vm3, %v1444_v42  ;;  %v752_v50 = vadd.f32 %v1730_v38, %v751_v44  ;;  %v1518_v51 = vpop.f32.mrf.mxu0  ;;  %v1550_v52 = vpop.f32.mrf.mxu1 }
  0xfd   : > { %1148 = vst.msk [vmem:[%s1741_s27 + $0x34] sm:$0xf] %vm1134_vm3, %v1410_v45  ;;  %v1415_v53 = vpack.c.bf16 %v832_v47, %v832_v47  ;;  %v1447_v54 = vpack.c.bf16 %v864_v48, %v864_v48  ;;  %v635_v55 = vadd.f32 %v1518_v51, %v1730_v38  ;;  %v763_v56 = vadd.f32 %v1550_v52, %v1730_v38 }
  0xfe   : > { %1180 = vst.msk [vmem:[%s1741_s27 + $0xb4] sm:$0xf] %vm1134_vm3, %v1442_v46  ;;  %v830_v57 = vmax.f32 %v624_v49, 0.0  ;;  %v862_v58 = vmax.f32 %v752_v50, 0.0  ;;  %v626_v59 = vpop.f32.mrf.mxu0  ;;  %v754_v60 = vpop.f32.mrf.mxu1 }
  0xff   : > { %1153 = vst.msk [vmem:[%s1741_s27 + $0x48] sm:$0xf] %vm1134_vm3, %v1415_v53  ;;  %1185 = vst.msk [vmem:[%s1741_s27 + $0xc8] sm:$0xf] %vm1134_vm3, %v1447_v54  ;;  %v833_v61 = vmax.f32 %v635_v55, 0.0  ;;  %v865_v62 = vmax.f32 %v763_v56, 0.0  ;;  %v627_v63 = vadd.f32 %v1730_v38, %v626_v59  ;;  %v755_v0 = vadd.f32 %v1730_v38, %v754_v60 }
 0x100   : > { %v1413_v1 = vpack.c.bf16 %v830_v57, %v830_v57  ;;  %v1445_v2 = vpack.c.bf16 %v862_v58, %v862_v58  ;;  %v1521_v3 = vpop.f32.mrf.mxu0  ;;  %v1553_v4 = vpop.f32.mrf.mxu1 }
 0x101   : > { %v1416_v5 = vpack.c.bf16 %v833_v61, %v833_v61  ;;  %v1448_v6 = vpack.c.bf16 %v865_v62, %v865_v62  ;;  %v831_v7 = vmax.f32 %v627_v63, 0.0  ;;  %v863_v8 = vmax.f32 %v755_v0, 0.0 }
 0x102   : > { %1151 = vst.msk [vmem:[%s1741_s27 + $0x40] sm:$0xf] %vm1134_vm3, %v1413_v1  ;;  %1183 = vst.msk [vmem:[%s1741_s27 + $0xc0] sm:$0xf] %vm1134_vm3, %v1445_v2  ;;  %v648_v9 = vadd.f32 %v1521_v3, %v1730_v38  ;;  %v776_v10 = vadd.f32 %v1553_v4, %v1730_v38  ;;  %v639_v11 = vpop.f32.mrf.mxu0  ;;  %v767_v12 = vpop.f32.mrf.mxu1 }
 0x103   : > { %1154 = vst.msk [vmem:[%s1741_s27 + $0x4c] sm:$0xf] %vm1134_vm3, %v1416_v5  ;;  %1186 = vst.msk [vmem:[%s1741_s27 + $0xcc] sm:$0xf] %vm1134_vm3, %v1448_v6  ;;  %v1414_v13 = vpack.c.bf16 %v831_v7, %v831_v7  ;;  %v1446_v14 = vpack.c.bf16 %v863_v8, %v863_v8  ;;  %v640_v15 = vadd.f32 %v1730_v38, %v639_v11 }
 0x104   : > { %v768_v16 = vadd.f32 %v1730_v38, %v767_v12  ;;  %v836_v17 = vmax.f32 %v648_v9, 0.0  ;;  %v868_v18 = vmax.f32 %v776_v10, 0.0  ;;  %v1522_v19 = vpop.f32.mrf.mxu0  ;;  %v1554_v20 = vpop.f32.mrf.mxu1 }
 0x105   : > { %1152 = vst.msk [vmem:[%s1741_s27 + $0x44] sm:$0xf] %vm1134_vm3, %v1414_v13  ;;  %1184 = vst.msk [vmem:[%s1741_s27 + $0xc4] sm:$0xf] %vm1134_vm3, %v1446_v14  ;;  %v834_v21 = vmax.f32 %v640_v15, 0.0  ;;  %v651_v23 = vadd.f32 %v1522_v19, %v1730_v38  ;;  %v779_v24 = vadd.f32 %v1554_v20, %v1730_v38 }
 0x106   : > { %v866_v22 = vmax.f32 %v768_v16, 0.0  ;;  %v1419_v25 = vpack.c.bf16 %v836_v17, %v836_v17  ;;  %v1451_v26 = vpack.c.bf16 %v868_v18, %v868_v18  ;;  %v642_v27 = vpop.f32.mrf.mxu0  ;;  %v770_v28 = vpop.f32.mrf.mxu1 }
 0x107   : > { %v1417_v29 = vpack.c.bf16 %v834_v21, %v834_v21  ;;  %v837_v31 = vmax.f32 %v651_v23, 0.0  ;;  %v869_v32 = vmax.f32 %v779_v24, 0.0  ;;  %v643_v33 = vadd.f32 %v1730_v38, %v642_v27 }
 0x108   : > { %v1449_v30 = vpack.c.bf16 %v866_v22, %v866_v22  ;;  %1157 = vst.msk [vmem:[%s1741_s27 + $0x58] sm:$0xf] %vm1134_vm3, %v1419_v25  ;;  %1189 = vst.msk [vmem:[%s1741_s27 + $0xd8] sm:$0xf] %vm1134_vm3, %v1451_v26  ;;  %v771_v34 = vadd.f32 %v1730_v38, %v770_v28  ;;  %v1525_v35 = vpop.f32.mrf.mxu0  ;;  %v1557_v36 = vpop.f32.mrf.mxu1 }
 0x109   : > { %1155 = vst.msk [vmem:[%s1741_s27 + $0x50] sm:$0xf] %vm1134_vm3, %v1417_v29  ;;  %v1420_v37 = vpack.c.bf16 %v837_v31, %v837_v31  ;;  %v1452_v39 = vpack.c.bf16 %v869_v32, %v869_v32  ;;  %v664_v40 = vadd.f32 %v1525_v35, %v1730_v38  ;;  %v792_v41 = vadd.f32 %v1557_v36, %v1730_v38 }
 0x10a   : > { %1187 = vst.msk [vmem:[%s1741_s27 + $0xd0] sm:$0xf] %vm1134_vm3, %v1449_v30  ;;  %v835_v42 = vmax.f32 %v643_v33, 0.0  ;;  %v867_v43 = vmax.f32 %v771_v34, 0.0  ;;  %v655_v44 = vpop.f32.mrf.mxu0  ;;  %v783_v45 = vpop.f32.mrf.mxu1 }
 0x10b   : > { %1158 = vst.msk [vmem:[%s1741_s27 + $0x5c] sm:$0xf] %vm1134_vm3, %v1420_v37  ;;  %1190 = vst.msk [vmem:[%s1741_s27 + $0xdc] sm:$0xf] %vm1134_vm3, %v1452_v39  ;;  %v840_v46 = vmax.f32 %v664_v40, 0.0  ;;  %v872_v47 = vmax.f32 %v792_v41, 0.0  ;;  %v656_v48 = vadd.f32 %v1730_v38, %v655_v44  ;;  %v784_v49 = vadd.f32 %v1730_v38, %v783_v45 }
 0x10c   : > { %v1418_v50 = vpack.c.bf16 %v835_v42, %v835_v42  ;;  %v1450_v51 = vpack.c.bf16 %v867_v43, %v867_v43  ;;  %v1526_v52 = vpop.f32.mrf.mxu0  ;;  %v1558_v53 = vpop.f32.mrf.mxu1 }
 0x10d   : > { %v1423_v54 = vpack.c.bf16 %v840_v46, %v840_v46  ;;  %v1455_v55 = vpack.c.bf16 %v872_v47, %v872_v47  ;;  %v838_v56 = vmax.f32 %v656_v48, 0.0  ;;  %v870_v57 = vmax.f32 %v784_v49, 0.0 }
 0x10e   : > { %1156 = vst.msk [vmem:[%s1741_s27 + $0x54] sm:$0xf] %vm1134_vm3, %v1418_v50  ;;  %1188 = vst.msk [vmem:[%s1741_s27 + $0xd4] sm:$0xf] %vm1134_vm3, %v1450_v51  ;;  %v667_v58 = vadd.f32 %v1526_v52, %v1730_v38  ;;  %v795_v59 = vadd.f32 %v1558_v53, %v1730_v38  ;;  %v658_v60 = vpop.f32.mrf.mxu0  ;;  %v786_v61 = vpop.f32.mrf.mxu1 }
 0x10f   : > { %1161 = vst.msk [vmem:[%s1741_s27 + $0x68] sm:$0xf] %vm1134_vm3, %v1423_v54  ;;  %1193 = vst.msk [vmem:[%s1741_s27 + $0xe8] sm:$0xf] %vm1134_vm3, %v1455_v55  ;;  %v1421_v62 = vpack.c.bf16 %v838_v56, %v838_v56  ;;  %v1453_v63 = vpack.c.bf16 %v870_v57, %v870_v57  ;;  %v659_v0 = vadd.f32 %v1730_v38, %v658_v60 }
 0x110   : > { %v787_v1 = vadd.f32 %v1730_v38, %v786_v61  ;;  %v841_v2 = vmax.f32 %v667_v58, 0.0  ;;  %v873_v3 = vmax.f32 %v795_v59, 0.0  ;;  %v1529_v4 = vpop.f32.mrf.mxu0  ;;  %v1561_v5 = vpop.f32.mrf.mxu1 }
 0x111   : > { %1159 = vst.msk [vmem:[%s1741_s27 + $0x60] sm:$0xf] %vm1134_vm3, %v1421_v62  ;;  %1191 = vst.msk [vmem:[%s1741_s27 + $0xe0] sm:$0xf] %vm1134_vm3, %v1453_v63  ;;  %v839_v6 = vmax.f32 %v659_v0, 0.0  ;;  %v680_v8 = vadd.f32 %v1529_v4, %v1730_v38  ;;  %v808_v9 = vadd.f32 %v1561_v5, %v1730_v38 }
 0x112   : > { %v871_v7 = vmax.f32 %v787_v1, 0.0  ;;  %v1424_v10 = vpack.c.bf16 %v841_v2, %v841_v2  ;;  %v1456_v11 = vpack.c.bf16 %v873_v3, %v873_v3  ;;  %v671_v12 = vpop.f32.mrf.mxu0  ;;  %v799_v13 = vpop.f32.mrf.mxu1 }
 0x113   : > { %v1422_v14 = vpack.c.bf16 %v839_v6, %v839_v6  ;;  %v844_v16 = vmax.f32 %v680_v8, 0.0  ;;  %v876_v17 = vmax.f32 %v808_v9, 0.0  ;;  %v672_v18 = vadd.f32 %v1730_v38, %v671_v12 }
 0x114   : > { %v1454_v15 = vpack.c.bf16 %v871_v7, %v871_v7  ;;  %1162 = vst.msk [vmem:[%s1741_s27 + $0x6c] sm:$0xf] %vm1134_vm3, %v1424_v10  ;;  %1194 = vst.msk [vmem:[%s1741_s27 + $0xec] sm:$0xf] %vm1134_vm3, %v1456_v11  ;;  %v800_v19 = vadd.f32 %v1730_v38, %v799_v13  ;;  %v1530_v20 = vpop.f32.mrf.mxu0  ;;  %v1562_v21 = vpop.f32.mrf.mxu1 }
 0x115   : > { %1160 = vst.msk [vmem:[%s1741_s27 + $0x64] sm:$0xf] %vm1134_vm3, %v1422_v14  ;;  %v1427_v22 = vpack.c.bf16 %v844_v16, %v844_v16  ;;  %v1459_v23 = vpack.c.bf16 %v876_v17, %v876_v17  ;;  %v683_v24 = vadd.f32 %v1530_v20, %v1730_v38  ;;  %v811_v25 = vadd.f32 %v1562_v21, %v1730_v38 }
 0x116   : > { %1192 = vst.msk [vmem:[%s1741_s27 + $0xe4] sm:$0xf] %vm1134_vm3, %v1454_v15  ;;  %v842_v26 = vmax.f32 %v672_v18, 0.0  ;;  %v874_v27 = vmax.f32 %v800_v19, 0.0  ;;  %v674_v28 = vpop.f32.mrf.mxu0  ;;  %v802_v29 = vpop.f32.mrf.mxu1 }
 0x117   : > { %1165 = vst.msk [vmem:[%s1741_s27 + $0x78] sm:$0xf] %vm1134_vm3, %v1427_v22  ;;  %1197 = vst.msk [vmem:[%s1741_s27 + $0xf8] sm:$0xf] %vm1134_vm3, %v1459_v23  ;;  %v845_v30 = vmax.f32 %v683_v24, 0.0  ;;  %v877_v31 = vmax.f32 %v811_v25, 0.0  ;;  %v675_v32 = vadd.f32 %v1730_v38, %v674_v28  ;;  %v803_v33 = vadd.f32 %v1730_v38, %v802_v29 }
 0x118   : > { %v1425_v34 = vpack.c.bf16 %v842_v26, %v842_v26  ;;  %v1457_v35 = vpack.c.bf16 %v874_v27, %v874_v27 }
 0x119   : > { %v1428_v36 = vpack.c.bf16 %v845_v30, %v845_v30  ;;  %v1460_v37 = vpack.c.bf16 %v877_v31, %v877_v31  ;;  %v843_v39 = vmax.f32 %v675_v32, 0.0  ;;  %v875_v40 = vmax.f32 %v803_v33, 0.0 }
 0x11a   : > { %1163 = vst.msk [vmem:[%s1741_s27 + $0x70] sm:$0xf] %vm1134_vm3, %v1425_v34  ;;  %1195 = vst.msk [vmem:[%s1741_s27 + $0xf0] sm:$0xf] %vm1134_vm3, %v1457_v35 }
 0x11b   : > { %1166 = vst.msk [vmem:[%s1741_s27 + $0x7c] sm:$0xf] %vm1134_vm3, %v1428_v36  ;;  %1198 = vst.msk [vmem:[%s1741_s27 + $0xfc] sm:$0xf] %vm1134_vm3, %v1460_v37  ;;  %v1426_v41 = vpack.c.bf16 %v843_v39, %v843_v39  ;;  %v1458_v42 = vpack.c.bf16 %v875_v40, %v875_v40 }
 0x11d   : > { %1164 = vst.msk [vmem:[%s1741_s27 + $0x74] sm:$0xf] %vm1134_vm3, %v1426_v41  ;;  %1196 = vst.msk [vmem:[%s1741_s27 + $0xf4] sm:$0xf] %vm1134_vm3, %v1458_v42 }
 0x11e PF: > { %s13_s12 = sadd.s32 1, %s1616_s12  }
 0x11f   : > { %p10_p4 = scmp.ge.s32.totalorder %s13_s12, 89  }
 0x121   :  { %12 = sbr.rel (!%p10_p4) target bundleno = 1 (0x1), region = 62 }

</bundles_post_ra>
